<compile_context>
chip_gen: v6e
topology: v6e:2x2x1
jax: 0.10.0
libtpu: 0.0.40
codegen_flags: <defaults>
</compile_context>

<pallas_src>
import functools

import jax
import jax.numpy as jnp
from jax import lax
from jax.experimental import pallas as pl
from jax.experimental.pallas import tpu as pltpu


def _round_up(x, m):
    return ((x + m - 1) // m) * m


def _pick_batch_tile(batch, max_tb):
    """Batch-tile size: lane-aligned, VMEM-bounded, >=2 grid steps at large B."""
    # Half the batch (rounded up to the 128-lane tile) so v7x's two TensorCores
    # both get work via dimension_semantics=("parallel",); capped by max_tb.
    tb = min(max_tb, _round_up(max(-(-batch // 2), 1), 128))
    if tb >= batch:
        return batch          # single exact block: block dims == array dims
    return tb


def _mlp_kernel(a_ref, b_ref, w0a_ref, w0b_ref, b0_ref,
                w1_ref, b1_ref, w2_ref, b2_ref, o_ref, *, bf16_tanh):
    # Contract the LAST dims of both operands: (out_f, in_f) x (tb, in_f)
    # -> (out_f, tb).  This feeds the row-major input tiles to the MXU without
    # any explicit transpose (the torch.cat is folded by splitting w0).
    dn = (((1,), (1,)), ((), ()))
    # Layer 0: Linear(3+5 -> 64) + bias + ReLU, feature-major result (64, tb).
    h = lax.dot_general(w0a_ref[...], a_ref[...], dn,
                        preferred_element_type=jnp.float32)
    h = h + lax.dot_general(w0b_ref[...], b_ref[...], dn,
                            preferred_element_type=jnp.float32)
    h = jnp.maximum(h + b0_ref[...], 0.0)
    # Layer 1: Linear(64 -> 64) + Tanh.
    h = jnp.dot(w1_ref[...], h, preferred_element_type=jnp.float32) + b1_ref[...]
    if bf16_tanh:
        # v6e/v7x: native bf16 EUP tanh at ~2x f32 throughput (looser accuracy).
        h = jnp.tanh(h.astype(jnp.bfloat16)).astype(jnp.float32)
    else:
        h = jnp.tanh(h)
    # Layer 2: Linear(64 -> 8), then one small (8, tb) -> (tb, 8) transpose so
    # the row-major output tile is written directly (no wrapper-side pass).
    y = jnp.dot(w2_ref[...], h, preferred_element_type=jnp.float32) + b2_ref[...]
    o_ref[...] = y.T.astype(o_ref.dtype)


@functools.partial(jax.jit, static_argnames=("max_tb", "bf16_tanh"))
def neural_network_forward(a, b, params, max_tb=8192, bf16_tanh=False):
    """Fused forward pass of NeuralNetwork([(3,), (5,)], [...]).

    a: (B, 3) float32, b: (B, 5) float32 -- the two forward(*args) streams,
    row-major exactly as the torch module receives them.
    params: torch-layout weights:
        w0: (64, 8), b0: (64, 1), w1: (64, 64), b1: (64, 1),
        w2: (8, 64),  b2: (8, 1)
    Returns (B, 8) float32, row-major.
    """
    B, da = a.shape
    db = b.shape[1]
    hidden = params["w1"].shape[0]
    out_dim = params["w2"].shape[0]

    # Split w0 so torch.cat(a, b) never has to be materialized anywhere.
    w0a = params["w0"][:, :da]          # (hidden, da)
    w0b = params["w0"][:, da:]          # (hidden, db)
    b0, w1, b1, w2, b2 = (params["b0"], params["w1"], params["b1"],
                          params["w2"], params["b2"])

    tb = _pick_batch_tile(B, max_tb)
    grid = (pl.cdiv(B, tb),)

    def resident(shape):
        # Full-array block with a constant index map: DMA'd once, stays
        # VMEM-resident across all grid steps.
        return pl.BlockSpec(shape, lambda i: (0, 0))

    weight_bytes = 4 * (hidden * (da + db) + hidden
                        + hidden * hidden + hidden
                        + out_dim * hidden + out_dim)
    cost = pl.CostEstimate(
        flops=2 * B * hidden * (da + db + hidden + out_dim),
        transcendentals=B * hidden,
        bytes_accessed=4 * B * (da + db + out_dim) + weight_bytes,
    )

    return pl.pallas_call(
        functools.partial(_mlp_kernel, bf16_tanh=bf16_tanh),
        out_shape=jax.ShapeDtypeStruct((B, out_dim), jnp.float32),
        grid=grid,
        in_specs=[
            pl.BlockSpec((tb, da), lambda i: (i, 0)),        # a, row-major tile
            pl.BlockSpec((tb, db), lambda i: (i, 0)),        # b, row-major tile
            resident((hidden, da)),                          # w0a
            resident((hidden, db)),                          # w0b
            resident((hidden, 1)),                           # b0
            resident((hidden, hidden)),                      # w1
            resident((hidden, 1)),                           # b1
            resident((out_dim, hidden)),                     # w2
            resident((out_dim, 1)),                          # b2
        ],
        out_specs=pl.BlockSpec((tb, out_dim), lambda i: (i, 0)),
        compiler_params=pltpu.CompilerParams(
            dimension_semantics=("parallel",),
            vmem_limit_bytes=48 * 1024 * 1024),
        cost_estimate=cost,
    )(a, b, w0a, w0b, b0, w1, b1, w2, b2)


def init_params(key, in_dim, hidden, out_dim):
    """Deterministic init mimicking torch.nn.Linear's U(-1/sqrt(fan_in), +).

    Weights in torch layout (out_features, in_features); biases as
    (out_features, 1) columns for the feature-major kernel.
    """
    ks = jax.random.split(key, 6)

    def linear(kw, kb, fan_in, fan_out):
        bound = 1.0 / jnp.sqrt(float(fan_in))
        w = jax.random.uniform(kw, (fan_out, fan_in), jnp.float32, -bound, bound)
        b = jax.random.uniform(kb, (fan_out, 1), jnp.float32, -bound, bound)
        return w, b

    w0, b0 = linear(ks[0], ks[1], in_dim, hidden)
    w1, b1 = linear(ks[2], ks[3], hidden, hidden)
    w2, b2 = linear(ks[4], ks[5], hidden, out_dim)
    return dict(w0=w0, b0=b0, w1=w1, b1=b1, w2=w2, b2=b2)


def reference_forward(a, b, p):
    """Plain-JAX reference identical to the torch module's math."""
    x = jnp.concatenate([a, b], axis=-1)   # cat(args, -1); Flatten is a 2-D no-op
    h = jnp.maximum(x @ p["w0"].T + p["b0"].T, 0.0)
    h = jnp.tanh(h @ p["w1"].T + p["b1"].T)
    return h @ p["w2"].T + p["b2"].T


if __name__ == "__main__":
    key = jax.random.PRNGKey(0)
    k_a, k_b, k_p = jax.random.split(key, 3)

    B = 2
    in_dims = [(3,), (5,)]          # two input streams, concatenated on dim=-1
    in_dim = 3 + 5                  # 8
    hidden = 64
    out_dim = 8

    # Two input tensors, as in forward(*args)
    a = jax.random.normal(k_a, (B, in_dims[0][0]), jnp.float32)
    b = jax.random.normal(k_b, (B, in_dims[1][0]), jnp.float32)

    params = init_params(k_p, in_dim, hidden, out_dim)

    out = neural_network_forward(a, b, params)
    out = jax.block_until_ready(out)

    ref = reference_forward(a, b, params)
    assert out.shape == (B, out_dim)
    assert jnp.allclose(out, ref, atol=1e-4, rtol=1e-4), (
        float(jnp.max(jnp.abs(out - ref))))

    print("KERNEL_OK")
</pallas_src>

<mosaic_0001>
module attributes {stable_mosaic.version = 11 : i64} {
  func.func @_mlp_kernel(%arg0: i32, %arg1: memref<2x3xf32, #tpu.memory_space<vmem>>, %arg2: memref<2x5xf32, #tpu.memory_space<vmem>>, %arg3: memref<64x3xf32, #tpu.memory_space<vmem>>, %arg4: memref<64x5xf32, #tpu.memory_space<vmem>>, %arg5: memref<64x1xf32, #tpu.memory_space<vmem>>, %arg6: memref<64x64xf32, #tpu.memory_space<vmem>>, %arg7: memref<64x1xf32, #tpu.memory_space<vmem>>, %arg8: memref<8x64xf32, #tpu.memory_space<vmem>>, %arg9: memref<8x1xf32, #tpu.memory_space<vmem>>, %arg10: memref<2x8xf32, #tpu.memory_space<vmem>>) attributes {dimension_semantics = [#tpu.dimension_semantics<parallel>], iteration_bounds = array<i64: 1>, scalar_prefetch = 0 : i64, scratch_operands = 0 : i64, tpu.core_type = #tpu.core_type<tc>, window_params = [{transform_indices = @transform_0, window_bounds = array<i64: 2, 3>}, {transform_indices = @transform_1, window_bounds = array<i64: 2, 5>}, {pipeline_mode = #tpu.pipeline_mode<synchronous>, transform_indices = @transform_2, window_bounds = array<i64: 64, 3>}, {pipeline_mode = #tpu.pipeline_mode<synchronous>, transform_indices = @transform_3, window_bounds = array<i64: 64, 5>}, {pipeline_mode = #tpu.pipeline_mode<synchronous>, transform_indices = @transform_4, window_bounds = array<i64: 64, 1>}, {pipeline_mode = #tpu.pipeline_mode<synchronous>, transform_indices = @transform_5, window_bounds = array<i64: 64, 64>}, {pipeline_mode = #tpu.pipeline_mode<synchronous>, transform_indices = @transform_6, window_bounds = array<i64: 64, 1>}, {pipeline_mode = #tpu.pipeline_mode<synchronous>, transform_indices = @transform_7, window_bounds = array<i64: 8, 64>}, {pipeline_mode = #tpu.pipeline_mode<synchronous>, transform_indices = @transform_8, window_bounds = array<i64: 8, 1>}, {transform_indices = @transform_9, window_bounds = array<i64: 2, 8>}]} {
    %c0 = arith.constant 0 : index
    %c0_0 = arith.constant 0 : index
    %0 = vector.load %arg3[%c0, %c0_0] : memref<64x3xf32, #tpu.memory_space<vmem>>, vector<64x3xf32>
    %c0_1 = arith.constant 0 : index
    %c0_2 = arith.constant 0 : index
    %1 = vector.load %arg1[%c0_1, %c0_2] : memref<2x3xf32, #tpu.memory_space<vmem>>, vector<2x3xf32>
    %cst = arith.constant dense<0.000000e+00> : vector<64x2xf32>
    %2 = tpu.matmul %0, %1, %cst {dimension_numbers = #tpu.dot_dimension_numbers<[1], [1], [0], [0], [0, 0, 1, 0], [], []>} : vector<64x3xf32>, vector<2x3xf32>, vector<64x2xf32> -> vector<64x2xf32>
    %c0_3 = arith.constant 0 : index
    %c0_4 = arith.constant 0 : index
    %3 = vector.load %arg4[%c0_3, %c0_4] : memref<64x5xf32, #tpu.memory_space<vmem>>, vector<64x5xf32>
    %c0_5 = arith.constant 0 : index
    %c0_6 = arith.constant 0 : index
    %4 = vector.load %arg2[%c0_5, %c0_6] : memref<2x5xf32, #tpu.memory_space<vmem>>, vector<2x5xf32>
    %cst_7 = arith.constant dense<0.000000e+00> : vector<64x2xf32>
    %5 = tpu.matmul %3, %4, %cst_7 {dimension_numbers = #tpu.dot_dimension_numbers<[1], [1], [0], [0], [0, 0, 1, 0], [], []>} : vector<64x5xf32>, vector<2x5xf32>, vector<64x2xf32> -> vector<64x2xf32>
    %6 = arith.addf %2, %5 : vector<64x2xf32>
    %c0_8 = arith.constant 0 : index
    %c0_9 = arith.constant 0 : index
    %7 = vector.load %arg5[%c0_8, %c0_9] : memref<64x1xf32, #tpu.memory_space<vmem>>, vector<64x1xf32>
    %8 = vector.broadcast %7 : vector<64x1xf32> to vector<64x2xf32>
    %9 = arith.addf %6, %8 : vector<64x2xf32>
    %cst_10 = arith.constant 0.000000e+00 : f32
    %10 = vector.broadcast %cst_10 : f32 to vector<64x2xf32>
    %11 = arith.maximumf %9, %10 : vector<64x2xf32>
    %c0_11 = arith.constant 0 : index
    %c0_12 = arith.constant 0 : index
    %12 = vector.load %arg6[%c0_11, %c0_12] : memref<64x64xf32, #tpu.memory_space<vmem>>, vector<64x64xf32>
    %cst_13 = arith.constant dense<0.000000e+00> : vector<64x2xf32>
    %13 = tpu.matmul %12, %11, %cst_13 {dimension_numbers = #tpu.dot_dimension_numbers<[1], [0], [0], [1], [0, 0, 1, 1], [], []>} : vector<64x64xf32>, vector<64x2xf32>, vector<64x2xf32> -> vector<64x2xf32>
    %c0_14 = arith.constant 0 : index
    %c0_15 = arith.constant 0 : index
    %14 = vector.load %arg7[%c0_14, %c0_15] : memref<64x1xf32, #tpu.memory_space<vmem>>, vector<64x1xf32>
    %15 = vector.broadcast %14 : vector<64x1xf32> to vector<64x2xf32>
    %16 = arith.addf %13, %15 : vector<64x2xf32>
    %17 = math.tanh %16 : vector<64x2xf32>
    %c0_16 = arith.constant 0 : index
    %c0_17 = arith.constant 0 : index
    %18 = vector.load %arg8[%c0_16, %c0_17] : memref<8x64xf32, #tpu.memory_space<vmem>>, vector<8x64xf32>
    %cst_18 = arith.constant dense<0.000000e+00> : vector<8x2xf32>
    %19 = tpu.matmul %18, %17, %cst_18 {dimension_numbers = #tpu.dot_dimension_numbers<[1], [0], [0], [1], [0, 0, 1, 1], [], []>} : vector<8x64xf32>, vector<64x2xf32>, vector<8x2xf32> -> vector<8x2xf32>
    %c0_19 = arith.constant 0 : index
    %c0_20 = arith.constant 0 : index
    %20 = vector.load %arg9[%c0_19, %c0_20] : memref<8x1xf32, #tpu.memory_space<vmem>>, vector<8x1xf32>
    %21 = vector.broadcast %20 : vector<8x1xf32> to vector<8x2xf32>
    %22 = arith.addf %19, %21 : vector<8x2xf32>
    %23 = tpu.transpose %22, [1, 0] : vector<8x2xf32> -> vector<2x8xf32>
    %c0_21 = arith.constant 0 : index
    %c0_22 = arith.constant 0 : index
    %24 = vector.load %arg10[%c0_21, %c0_22] : memref<2x8xf32, #tpu.memory_space<vmem>>, vector<2x8xf32>
    tpu.vector_store %arg10[%c0_21, %c0_22], %23 {strides = array<i32>} : memref<2x8xf32, #tpu.memory_space<vmem>>, vector<2x8xf32>,
    return
  }
  func.func @transform_0(%arg0: i32) -> (i32, i32) {
    %c0_i32 = arith.constant 0 : i32
    %c0_i32_0 = arith.constant 0 : i32
    return %arg0, %c0_i32 : i32, i32
  }
  func.func @transform_1(%arg0: i32) -> (i32, i32) {
    %c0_i32 = arith.constant 0 : i32
    %c0_i32_0 = arith.constant 0 : i32
    return %arg0, %c0_i32 : i32, i32
  }
  func.func @transform_2(%arg0: i32) -> (i32, i32) {
    %c0_i32 = arith.constant 0 : i32
    %c0_i32_0 = arith.constant 0 : i32
    %c0_i32_1 = arith.constant 0 : i32
    return %c0_i32, %c0_i32_0 : i32, i32
  }
  func.func @transform_3(%arg0: i32) -> (i32, i32) {
    %c0_i32 = arith.constant 0 : i32
    %c0_i32_0 = arith.constant 0 : i32
    %c0_i32_1 = arith.constant 0 : i32
    return %c0_i32, %c0_i32_0 : i32, i32
  }
  func.func @transform_4(%arg0: i32) -> (i32, i32) {
    %c0_i32 = arith.constant 0 : i32
    %c0_i32_0 = arith.constant 0 : i32
    %c0_i32_1 = arith.constant 0 : i32
    return %c0_i32, %c0_i32_0 : i32, i32
  }
  func.func @transform_5(%arg0: i32) -> (i32, i32) {
    %c0_i32 = arith.constant 0 : i32
    %c0_i32_0 = arith.constant 0 : i32
    %c0_i32_1 = arith.constant 0 : i32
    return %c0_i32, %c0_i32_0 : i32, i32
  }
  func.func @transform_6(%arg0: i32) -> (i32, i32) {
    %c0_i32 = arith.constant 0 : i32
    %c0_i32_0 = arith.constant 0 : i32
    %c0_i32_1 = arith.constant 0 : i32
    return %c0_i32, %c0_i32_0 : i32, i32
  }
  func.func @transform_7(%arg0: i32) -> (i32, i32) {
    %c0_i32 = arith.constant 0 : i32
    %c0_i32_0 = arith.constant 0 : i32
    %c0_i32_1 = arith.constant 0 : i32
    return %c0_i32, %c0_i32_0 : i32, i32
  }
  func.func @transform_8(%arg0: i32) -> (i32, i32) {
    %c0_i32 = arith.constant 0 : i32
    %c0_i32_0 = arith.constant 0 : i32
    %c0_i32_1 = arith.constant 0 : i32
    return %c0_i32, %c0_i32_0 : i32, i32
  }
  func.func @transform_9(%arg0: i32) -> (i32, i32) {
    %c0_i32 = arith.constant 0 : i32
    %c0_i32_0 = arith.constant 0 : i32
    return %arg0, %c0_i32 : i32, i32
  }
}

</mosaic_0001>

<bundles_post_ra>
// kernel: neural_network_forward.1
= control target key start
LH: loop header
LB: loop body
LE: loop exit
PB: predicated region body
PF: predicated region fallthrough
CT: control target
= control target key end

     0   :  { %vm51_vm0 = vcmask 39936   ;;  %vm184_vm1 = vcmask 23552   ;;  %v892_v8 = vmov 0   ;;  %s1110_s0 = inlined_call_operand.vmem [shape: f32[2,3], index: 0, kind: input, shape index: {}]   ;;  %s1111_s1 = inlined_call_operand.vmem [shape: f32[2,5], index: 1, kind: input, shape index: {}]   ;;  %s1112_s2 = inlined_call_operand.vmem [shape: f32[64,3], index: 2, kind: input, shape index: {}]   ;;  %s1113_s3 = inlined_call_operand.vmem [shape: f32[64,5], index: 3, kind: input, shape index: {}]   ;;  %s1114_s4 = inlined_call_operand.vmem [shape: f32[64,1], index: 4, kind: input, shape index: {}]   ;;  %s1115_s5 = inlined_call_operand.vmem [shape: f32[64,64], index: 5, kind: input, shape index: {}]   ;;  %s1116_s6 = inlined_call_operand.vmem [shape: f32[64,1], index: 6, kind: input, shape index: {}]   ;;  %s1117_s7 = inlined_call_operand.vmem [shape: f32[8,64], index: 7, kind: input, shape index: {}]   ;;  %s1118_s8 = inlined_call_operand.vmem [shape: f32[8,1], index: 8, kind: input, shape index: {}]   ;;  %s1119_s9 = inlined_call_operand.hbm [shape: f32[2,8], index: 9, kind: output, shape index: {}]  }
   0x1   :  { %v50_v0 = vld [vmem:[%s1111_s1] sm:$0x3]  ;;  %v43_v4 = vld [vmem:[%s1113_s3 + $0x8] sm:$0xff]  ;;  %v44_v6 = vld [vmem:[%s1113_s3 + $0x10] sm:$0xff]  ;;  %852 = vset.pattern.permute.xlu0 %v892_v8  ;;  %853 = vset.pattern.permute.xlu1 %v892_v8 }
   0x2   :  { %v41_v1 = vld [vmem:[%s1110_s0] sm:$0x3]  ;;  %773 = vmatprep.subr.msk.mxu0 %vm51_vm0, %v50_v0  ;;  %v34_v5 = vld [vmem:[%s1112_s2 + $0x8] sm:$0xff]  ;;  %v35_v7 = vld [vmem:[%s1112_s2 + $0x10] sm:$0xff] }
   0x3   :  { %787 = vmatprep.subr.msk.mxu1 %vm184_vm1, %v41_v1  ;;  %v42_v2 = vld [vmem:[%s1113_s3] sm:$0xff]  ;;  %774 = vmatpush3.xpose.msk.msra.mxu0 %vm51_vm0, %v50_v0  ;;  %v45_v9 = vld [vmem:[%s1113_s3 + $0x18] sm:$0xff]  ;;  %v322_v14 = vld [vmem:[%s1114_s4 + $0x28] sm:$0xff] }
   0x4   :  { %v33_v3 = vld [vmem:[%s1112_s2] sm:$0xff]  ;;  %788 = vmatpush3.xpose.msk.msra.mxu1 %vm184_vm1, %v41_v1  ;;  %775 = vmatprep.mubr.msk.f32.mxu0 %vm51_vm0, %v42_v2  ;;  %v36_v10 = vld [vmem:[%s1112_s2 + $0x18] sm:$0xff]  ;;  %v323_v15 = vld [vmem:[%s1114_s4 + $0x30] sm:$0xff] }
   0x5   :  { %789 = vmatprep.mubr.msk.f32.mxu1 %vm184_vm1, %v33_v3  ;;  %v324_v11 = vld [vmem:[%s1114_s4 + $0x38] sm:$0xff]  ;;  %v46_v12 = vld [vmem:[%s1113_s3 + $0x20] sm:$0xff]  ;;  %352 = vperm.xlu1 %853, %v322_v14   ;;  %v47_v17 = vld [vmem:[%s1113_s3 + $0x28] sm:$0xff] }
   0x6   :  { %776 = vmatmul.mubr.msk.f32.vlgmr.msra.gmra.mxu0 %vm51_vm0, %v43_v4  ;;  %v37_v13 = vld [vmem:[%s1112_s2 + $0x20] sm:$0xff]  ;;  %362 = vperm.xlu0 %852, %v324_v11   ;;  %v38_v18 = vld [vmem:[%s1112_s2 + $0x28] sm:$0xff]  ;;  %v48_v19 = vld [vmem:[%s1113_s3 + $0x30] sm:$0xff] }
   0x7   :  { %790 = vmatmul.mubr.msk.f32.vlgmr.msra.gmra.mxu1 %vm184_vm1, %v34_v5  ;;  %778 = vmatprep.mubr.msk.f32.mxu0 %vm51_vm0, %v44_v6  ;;  %v321_v16 = vld [vmem:[%s1114_s4 + $0x20] sm:$0xff]  ;;  %v39_v20 = vld [vmem:[%s1112_s2 + $0x30] sm:$0xff]  ;;  %v320_v21 = vld [vmem:[%s1114_s4 + $0x18] sm:$0xff] }
   0x8   :  { %792 = vmatprep.mubr.msk.f32.mxu1 %vm184_vm1, %v35_v7 }
   0x9   :  { %347 = vperm.xlu1 %853, %v321_v16  }
   0xa   :  { %779 = vmatmul.mubr.msk.f32.gmra.mxu0 %vm51_vm0, %v45_v9  ;;  %357 = vperm.xlu0 %852, %v323_v15  }
   0xb   :  { %793 = vmatmul.mubr.msk.f32.gmra.mxu1 %vm184_vm1, %v36_v10  ;;  %781 = vmatprep.mubr.msk.f32.mxu0 %vm51_vm0, %v46_v12 }
   0xc   :  { %795 = vmatprep.mubr.msk.f32.mxu1 %vm184_vm1, %v37_v13 }
   0xd   :  { %14 = vsyncpa [#allocation3], 0  ;;  %v319_v22 = vld [vmem:[%s1114_s4 + $0x10] sm:$0xff]  ;;  %v49_v23 = vld [vmem:[%s1113_s3 + $0x38] sm:$0xff]  ;;  %vm437_vm2 = vcmask 523264   ;;  %vm894_vm3 = vmmov 0  }
   0xe   :  { %782 = vmatmul.mubr.msk.f32.gmra.mxu0 %vm51_vm0, %v47_v17  ;;  %v40_v24 = vld [vmem:[%s1112_s2 + $0x38] sm:$0xff]  ;;  %342 = vperm.xlu0 %852, %v320_v21   ;;  %v318_v25 = vld [vmem:[%s1114_s4 + $0x8] sm:$0xff]  ;;  %v317_v26 = vld [vmem:[%s1114_s4] sm:$0xff]  ;;  %s895_s18 = smov [#allocation2]   ;;  %vm687_vm4 = vcmask 58368  }
   0xf   :  { %796 = vmatmul.mubr.msk.f32.gmra.mxu1 %vm184_vm1, %v38_v18  ;;  %784 = vmatprep.mubr.msk.f32.mxu0 %vm51_vm0, %v48_v19  ;;  %v396_v27 = vld [vmem:[%s1116_s6 + $0x38] sm:$0xff]  ;;  %v395_v28 = vld [vmem:[%s1116_s6 + $0x30] sm:$0xff]  ;;  %v394_v29 = vld [vmem:[%s1116_s6 + $0x28] sm:$0xff]  ;;  %s695_s4 = sshll.u32 %s895_s18, 4  ;;  %s696_s4 = int_to_ptr.vmem [resolvable:$true] %s695_s4 }
  0x10   :  { %798 = vmatprep.mubr.msk.f32.mxu1 %vm184_vm1, %v39_v20  ;;  %337 = vperm.xlu1 %853, %v319_v22   ;;  %v393_v30 = vld [vmem:[%s1116_s6 + $0x20] sm:$0xff]  ;;  %v392_v31 = vld [vmem:[%s1116_s6 + $0x18] sm:$0xff]  ;;  %v391_v32 = vld [vmem:[%s1116_s6 + $0x10] sm:$0xff]  ;;  %s870_s19 = scalar_lea.vmem %s696_s4, 32  ;;  %p875_p1 = scmp.lt.s32.totalorder %s696_s4, %s696_s4 }
  0x11   :  { %v390_v33 = vld [vmem:[%s1116_s6 + $0x8] sm:$0xff]  ;;  %v389_v34 = vld [vmem:[%s1116_s6] sm:$0xff]  ;;  %v383_v22 = vld [vmem:[%s1115_s5 + $0x10] sm:$0xff]  ;;  %p871_p0 = scmp.ne.s32.totalorder %s696_s4, %s870_s19  ;;  %p876_p2 = scmp.lt.s32.totalorder %s870_s19, %s870_s19 }
  0x12   :  { %785 = vmatmul.mubr.msk.f32.gmra.mxu0 %vm51_vm0, %v49_v23  ;;  %332 = vperm.xlu0 %852, %v318_v25   ;;  %v576_v35 = vld [vmem:[%s1118_s8] sm:$0xff]  ;;  %v382_v21 = vld [vmem:[%s1115_s5 + $0x8] sm:$0xff]  ;;  %v384_v23 = vld [vmem:[%s1115_s5 + $0x18] sm:$0xff] }
  0x13   :  { %799 = vmatmul.mubr.msk.f32.gmra.mxu1 %vm184_vm1, %v40_v24  ;;  %v381_v36 = vld [vmem:[%s1115_s5] sm:$0xff]  ;;  %v386_v25 = vld [vmem:[%s1115_s5 + $0x28] sm:$0xff]  ;;  %p877_p3 = por %p876_p2, %p875_p1 }
  0x14   :  { %327 = vperm.xlu1 %853, %v317_v26   ;;  %817 = vmatprep.mubr.msk.f32.mxu0 %vm437_vm2, %v381_v36  ;;  %v385_v24 = vld [vmem:[%s1115_s5 + $0x20] sm:$0xff]  ;;  %v387_v26 = vld [vmem:[%s1115_s5 + $0x30] sm:$0xff] }
  0x15   :  { %p878_p4 = pnand %p877_p3, %p871_p0 }
  0x16   :  { %434 = vperm.xlu0 %852, %v396_v27   ;;  %v388_v27 = vld [vmem:[%s1115_s5 + $0x38] sm:$0xff] }
  0x18   :  { %429 = vperm.xlu1 %853, %v395_v28   ;;  %v893_v28 = vmov 0.0  }
  0x19   :  { %829 = vmatprep.subr.mxu1 %v893_v28  ;;  %845 = vmatprep.mubr.msk.f32.mxu1 %vm894_vm3, %v893_v28 }
  0x1a   :  { %424 = vperm.xlu0 %852, %v394_v29  }
  0x1c   :  { %419 = vperm.xlu1 %853, %v393_v30  }
  0x1e   :  { %414 = vperm.xlu0 %852, %v392_v31  }
  0x20   :  { %409 = vperm.xlu1 %853, %v391_v32  }
  0x22   :  { %404 = vperm.xlu0 %852, %v390_v33  }
  0x24   :  { %399 = vperm.xlu1 %853, %v389_v34  }
  0x26   :  { %579 = vperm.xlu0 %852, %v576_v35  }
  0x80   :  { %v353_v46 = vpop.permute.xlu1 %352 }
  0x81   :  { %v363_v43 = vpop.permute.xlu0 %362 }
  0x84   :  { %v348_v54 = vpop.permute.xlu1 %347 }
  0x85   :  { %v358_v51 = vpop.permute.xlu0 %357 }
  0x89   :  { %v343_v2 = vpop.permute.xlu0 %342 }
  0x8b   :  { %v338_v6 = vpop.permute.xlu1 %337 }
  0x8d   :  { %v333_v13 = vpop.permute.xlu0 %332 }
  0x8f   :  { %v328_v16 = vpop.permute.xlu1 %327 }
  0x91   :  { %v435_v31 = vpop.permute.xlu0 %434 }
  0x93   :  { %v430_v33 = vpop.permute.xlu1 %429 }
  0x95   :  { %v425_v36 = vpop.permute.xlu0 %424 }
  0xc6   :  { %v777_v37 = vpop.f32.mrf.mxu0 }
  0xc7   :  { %v791_v38 = vpop.f32.mrf.mxu1 }
  0xc8   :  { %v145_v39 = vpop.f32.mrf.mxu0  ;;  %v284_v7 = vadd.f32 %v791_v38, %v777_v37  ;;  %v420_v38 = vpop.permute.xlu1 %419 }
  0xc9   :  { %v278_v40 = vpop.f32.mrf.mxu1 }
  0xca   :  { %v780_v41 = vpop.f32.mrf.mxu0  ;;  %v279_v10 = vadd.f32 %v278_v40, %v145_v39  ;;  %v366_v14 = vadd.f32 %v333_v13, %v284_v7 }
  0xcb   :  { %v794_v42 = vpop.f32.mrf.mxu1 }
  0xcc   :  { %v155_v44 = vpop.f32.mrf.mxu0  ;;  %v294_v62 = vadd.f32 %v794_v42, %v780_v41  ;;  %v365_v17 = vadd.f32 %v328_v16, %v279_v10  ;;  %v374_v19 = vmax.f32 %v366_v14, 0.0 }
  0xcd   :  { %v288_v45 = vpop.f32.mrf.mxu1 }
  0xce   :  { %v783_v47 = vpop.f32.mrf.mxu0  ;;  %v289_v3 = vadd.f32 %v288_v45, %v155_v44  ;;  %v368_v8 = vadd.f32 %v343_v2, %v294_v62  ;;  %v373_v20 = vmax.f32 %v365_v17, 0.0  ;;  %v415_v44 = vpop.permute.xlu0 %414 }
  0xcf   :  { %v797_v48 = vpop.f32.mrf.mxu1 }
  0xd0   :  { %v165_v49 = vpop.f32.mrf.mxu0  ;;  %v304_v55 = vadd.f32 %v797_v48, %v783_v47  ;;  %v367_v11 = vadd.f32 %v338_v6, %v289_v3  ;;  %v376_v15 = vmax.f32 %v368_v8, 0.0 }
  0xd1   :  { %v298_v50 = vpop.f32.mrf.mxu1 }
  0xd2   :  { %v786_v52 = vpop.f32.mrf.mxu0  ;;  %v299_v59 = vadd.f32 %v298_v50, %v165_v49  ;;  %v370_v63 = vadd.f32 %v353_v46, %v304_v55  ;;  %v375_v18 = vmax.f32 %v367_v11, 0.0  ;;  %v410_v46 = vpop.permute.xlu1 %409 }
  0xd3   :  { %v800_v53 = vpop.f32.mrf.mxu1  ;;  %v405_v49 = vpop.permute.xlu0 %404 }
  0xd4   :  { %v314_v56 = vadd.f32 %v800_v53, %v786_v52  ;;  %v175_v57 = vpop.f32.mrf.mxu0  ;;  %v369_v4 = vadd.f32 %v348_v54, %v299_v59  ;;  %v378_v9 = vmax.f32 %v370_v63, 0.0 }
  0xd5   :  { %v308_v58 = vpop.f32.mrf.mxu1 }
  0xd6   :  { %v372_v60 = vadd.f32 %v363_v43, %v314_v56  ;;  %v309_v61 = vadd.f32 %v308_v58, %v175_v57  ;;  %v377_v12 = vmax.f32 %v369_v4, 0.0 }
  0xd7   :  { %v580_v62 = vpop.permute.xlu0 %579 }
  0xd8   :  { %v380_v0 = vmax.f32 %v372_v60, 0.0  ;;  %v371_v1 = vadd.f32 %v358_v51, %v309_v61  ;;  %v400_v51 = vpop.permute.xlu1 %399  ;;  %v575_v60 = vld [vmem:[%s1117_s7] sm:$0xff] }
  0xda   :  { %v379_v5 = vmax.f32 %v371_v1, 0.0  ;;  %801 = vmatprep.subr.mxu0 %v380_v0 }
  0xdb   :  { %802 = vmatpush3.msra.mxu0 %v380_v0 }
  0xdc   :  { %803 = vmatprep.subr.mxu0 %v379_v5 }
  0xdd   :  { %804 = vmatpush3.msra.mxu0 %v379_v5 }
  0xde   :  { %805 = vmatprep.subr.mxu0 %v378_v9 }
  0xdf   :  { %806 = vmatpush3.msra.mxu0 %v378_v9 }
  0xe0   :  { %807 = vmatprep.subr.mxu0 %v377_v12 }
  0xe1   :  { %808 = vmatpush3.msra.mxu0 %v377_v12 }
  0xe2   :  { %809 = vmatprep.subr.mxu0 %v376_v15 }
  0xe3   :  { %810 = vmatpush3.msra.mxu0 %v376_v15 }
  0xe4   :  { %811 = vmatprep.subr.mxu0 %v375_v18 }
  0xe5   :  { %812 = vmatpush3.msra.mxu0 %v375_v18 }
  0xe6   :  { %813 = vmatprep.subr.mxu0 %v374_v19 }
  0xe7   :  { %814 = vmatpush3.msra.mxu0 %v374_v19 }
  0xe8   :  { %815 = vmatprep.subr.mxu0 %v373_v20 }
  0xe9   :  { %816 = vmatpush3.msra.mxu0 %v373_v20 }
  0xea   :  { %818 = vmatmul.mubr.msk.f32.vlgmr.msra.gmra.mxu0 %vm437_vm2, %v382_v21 }
  0xeb   :  { %820 = vmatprep.mubr.msk.f32.mxu0 %vm437_vm2, %v383_v22 }
  0xee   :  { %821 = vmatmul.mubr.msk.f32.gmra.mxu0 %vm437_vm2, %v384_v23 }
  0xef   :  { %823 = vmatprep.mubr.msk.f32.mxu0 %vm437_vm2, %v385_v24 }
  0xf2   :  { %824 = vmatmul.mubr.msk.f32.gmra.mxu0 %vm437_vm2, %v386_v25 }
  0xf3   :  { %826 = vmatprep.mubr.msk.f32.mxu0 %vm437_vm2, %v387_v26 }
  0xf6   :  { %827 = vmatmul.mubr.msk.f32.gmra.mxu0 %vm437_vm2, %v388_v27 }
 0x1aa   :  { %v819_v29 = vpop.f32.mrf.mxu0 }
 0x1ab   :  { %v534_v50 = vadd.f32 %v819_v29, %v405_v49 }
 0x1ac   :  { %v528_v30 = vpop.f32.mrf.mxu0 }
 0x1ad   :  { %v529_v52 = vadd.f32 %v528_v30, %v400_v51 }
 0x1ae   :  { %v822_v32 = vpop.f32.mrf.mxu0 }
 0x1af   :  { %v544_v47 = vadd.f32 %v822_v32, %v415_v44 }
 0x1b0   :  { %v538_v34 = vpop.f32.mrf.mxu0 }
 0x1b1   :  { %v539_v48 = vadd.f32 %v538_v34, %v410_v46 }
 0x1b2   :  { %v825_v35 = vpop.f32.mrf.mxu0 }
 0x1b3   :  { %v554_v42 = vadd.f32 %v825_v35, %v425_v36 }
 0x1b4   :  { %v548_v37 = vpop.f32.mrf.mxu0 }
 0x1b5   :  { %v549_v45 = vadd.f32 %v548_v37, %v420_v38 }
 0x1b6   :  { %v828_v39 = vpop.f32.mrf.mxu0 }
 0x1b7   :  { %v564_v40 = vadd.f32 %v828_v39, %v435_v31 }
 0x1b8   :  { %v558_v41 = vpop.f32.mrf.mxu0 }
 0x1b9   :  { %854 = vtanh.f32 %v564_v40  ;;  %v559_v43 = vadd.f32 %v558_v41, %v430_v33 }
 0x1bb   :  { %856 = vtanh.f32 %v559_v43 }
 0x1bc   :  { %858 = vtanh.f32 %v554_v42 }
 0x1bd   :  { %860 = vtanh.f32 %v549_v45 }
 0x1be   :  { %862 = vtanh.f32 %v544_v47 }
 0x1bf   :  { %864 = vtanh.f32 %v539_v48 }
 0x1c0   :  { %866 = vtanh.f32 %v534_v50 }
 0x1c1   :  { %868 = vtanh.f32 %v529_v52 }
 0x1c6   :  { %v855_v53 = vpop.eup %854 }
 0x1c7   :  { %830 = vmatpush3.msra.mxu1 %v855_v53 }
 0x1c8   :  { %v857_v54 = vpop.eup %856  ;;  %831 = vmatprep.subr.mxu1 %v893_v28 }
 0x1c9   :  { %832 = vmatpush3.msra.mxu1 %v857_v54  ;;  %v859_v55 = vpop.eup %858 }
 0x1ca   :  { %833 = vmatprep.subr.mxu1 %v893_v28  ;;  %v861_v56 = vpop.eup %860 }
 0x1cb   :  { %834 = vmatpush3.msra.mxu1 %v859_v55  ;;  %v863_v57 = vpop.eup %862 }
 0x1cc   :  { %835 = vmatprep.subr.mxu1 %v893_v28  ;;  %v865_v58 = vpop.eup %864 }
 0x1cd   :  { %836 = vmatpush3.msra.mxu1 %v861_v56  ;;  %v867_v59 = vpop.eup %866 }
 0x1ce   :  { %837 = vmatprep.subr.mxu1 %v893_v28  ;;  %v869_v61 = vpop.eup %868 }
 0x1cf   :  { %838 = vmatpush3.msra.mxu1 %v863_v57 }
 0x1d0   :  { %839 = vmatprep.subr.mxu1 %v893_v28 }
 0x1d1   :  { %840 = vmatpush3.msra.mxu1 %v865_v58 }
 0x1d2   :  { %841 = vmatprep.subr.mxu1 %v893_v28 }
 0x1d3   :  { %842 = vmatpush3.msra.mxu1 %v867_v59 }
 0x1d4   :  { %843 = vmatprep.subr.mxu1 %v893_v28 }
 0x1d5   :  { %844 = vmatpush3.msra.mxu1 %v869_v61 }
 0x1d6   :  { %846 = vmatmul.mubr.msk.f32.vlgmr.msra.gmra.mxu1 %vm437_vm2, %v575_v60 }
 0x296   :  { %v651_v63 = vpop.f32.mrf.mxu1 }
 0x297   :  { %v652_v0 = vadd.f32 %v651_v63, %v580_v62 }
 0x298   :  { %v847_v1 = vpop.f32.mrf.mxu1 }
 0x299   :  { %655 = vxpose.xlu1.b32.start.end [1/1] (short) (narrow) %v652_v0, 8 }
 0x315   :  { %v671_v2 = vpop.trf.xlu1 }
 0x316   :  { %688 = vst.msk [vmem:[#allocation2] sm:$0x3] %vm687_vm4, %v671_v2 }
 0x317   :  { %881 = shalt.err (!%p878_p4)
}
 0x318   :  { %698 = dma.vmem_to_hbm [thread:$0]  %s696_s4, 32, %s1119_s9, [#allocation3]  }
 0x319   :  { %890 = dma.done.wait [#allocation3], 32  }
 0x31a   :  { %891 = vsyncadd [#allocation3], 4294967264 }
 0x31b   :  { %702 = vsyncpa [#allocation3], 1 }

</bundles_post_ra>
